<compile_context>
chip_gen: v7x
topology: tpu7x:2x2x1
jax: 0.10.0
libtpu: 0.0.40
codegen_flags: <defaults>
</compile_context>

<pallas_src>
import numpy as np
import jax
import jax.numpy as jnp
from jax import lax
from jax.experimental import pallas as pl
from jax.experimental.pallas import tpu as pltpu

# ---- module hyperparameters (small, consistent with the PyTorch model) ----
B = 2                     # batch
LATENT = 8                # latent_dimension
HIDDEN_NEURONS = [32, 64]
H0, H1 = HIDDEN_NEURONS
L = 256                   # grid size (final dense hardcodes hidden_channels * 256)
CIN = 1                   # conv-stack input channels
HC = 4                    # hidden_channels
K = 3                     # kernel_size
PAD = 1                   # 'zeros' padding, length preserving
N_HID = 20                # hidden width of the final dense head
OUT_W = L + 128           # lane-dense output: lanes 0..255 = x, lanes 256/257/258 = scalars

# ---- packed weight-slab row layout (static offsets; multi-row blocks 8-aligned) ----
NB = B
FW1_STRIDE = 24                              # 20 real rows + 4 pad per channel block
O_WD0 = 0                                    # [LATENT, H1]
O_WD1 = O_WD0 + LATENT                       # [H1, H0]
O_WD2 = O_WD1 + H1                           # [H0, L]
O_A1 = O_WD2 + H0                            # [HC*NB, 3*CIN*NB + 1]
O_A2 = O_A1 + HC * NB                        # [HC*NB, 3*HC*NB + 1]
O_A3 = O_A2 + HC * NB
O_A4 = O_A3 + HC * NB
O_A5 = O_A4 + HC * NB
O_FW1 = O_A5 + HC * NB                       # HC blocks of [N_HID, L], stride FW1_STRIDE
O_BD0 = O_FW1 + HC * FW1_STRIDE              # single rows from here on
O_BD1 = O_BD0 + 1
O_BD2 = O_BD1 + 1
O_FB1 = O_BD2 + 1
O_FW2T = O_FB1 + 1
O_FB2 = O_FW2T + 1
O_V = O_FB2 + 1
O_DX = O_V + 1
SLAB_ROWS = ((O_DX + 1 + 7) // 8) * 8        # = 248


def energy_kernel(z_ref, w_ref, out_ref):
    f32 = jnp.float32
    nb = z_ref.shape[0]

    def rows(off, n):
        return w_ref[off:off + n, :]         # static row slice, lane-dense load

    # ---------------- VAE decoder MLP (3 MXU dots) ----------------
    wd0 = rows(O_WD0, LATENT)[:, :H1]
    wd1 = rows(O_WD1, H1)[:, :H0]
    wd2 = rows(O_WD2, H0)                    # [H0, L]
    bd0 = rows(O_BD0, 1)[:, :H1]
    bd1 = rows(O_BD1, 1)[:, :H0]
    bd2 = rows(O_BD2, 1)                     # [1, L]

    h = jnp.maximum(jnp.dot(z_ref[...], wd0, preferred_element_type=f32) + bd0, 0.0)
    h = jnp.maximum(jnp.dot(h, wd1, preferred_element_type=f32) + bd1, 0.0)
    x_dec = jnp.dot(h, wd2, preferred_element_type=f32) + bd2                  # [B, L]

    # ---- conv stack: one fused MXU dot per layer on a channel-major [C*B, L] slab ----
    # row r = c*nb + b  <->  (sample b, channel c); HC*B = 8 rows = full f32 vregs.
    lane = lax.broadcasted_iota(jnp.int32, (1, L), 1)
    keep_l = (lane >= 1).astype(f32)         # valid cols for tap x[:, i-1]
    keep_r = (lane < (L - 1)).astype(f32)    # valid cols for tap x[:, i+1]
    ones_row = jnp.ones((1, L), f32)         # bias tap

    def conv_relu(x_in, a_off, ncols):
        # x_in: [cin*nb, L]; A_cat: [HC*nb, 3*cin*nb + 1] = [kron(w[:,:,k], I_nb) | bias]
        xs = jnp.concatenate(
            [pltpu.roll(x_in, shift=1, axis=1) * keep_l,        # tap k=0 : x[:, i-1]
             x_in,                                              # tap k=1 : x[:, i]
             pltpu.roll(x_in, shift=L - 1, axis=1) * keep_r,    # tap k=2 : x[:, i+1]
             ones_row],                                         # bias fold
            axis=0)                                             # [3*cin*nb + 1, L]
        a_cat = rows(a_off, HC * nb)[:, :ncols]
        return jnp.maximum(jnp.dot(a_cat, xs, preferred_element_type=f32), 0.0)

    act = conv_relu(x_dec, O_A1, 3 * CIN * nb + 1)              # layer 1: cin = 1
    act = conv_relu(act, O_A2, 3 * HC * nb + 1)
    act = conv_relu(act, O_A3, 3 * HC * nb + 1)
    act = conv_relu(act, O_A4, 3 * HC * nb + 1)
    act = conv_relu(act, O_A5, 3 * HC * nb + 1)                 # [HC*nb, L]

    # ---- Flatten + Linear(HC*L, 20): HC lane-contracted dots, no concat, bias in init ----
    hd = rows(O_FB1, 1)[:, :N_HID]                              # [1, 20] -> broadcasts
    for c in range(HC):
        wblk = rows(O_FW1 + c * FW1_STRIDE, N_HID)              # [20, L] lane-dense
        act_c = act[c * nb:(c + 1) * nb, :]                     # [nb, L]
        hd = hd + lax.dot_general(act_c, wblk, (((1,), (1,)), ((), ())),
                                  preferred_element_type=f32)   # [nb, 20]
    hd = jnp.maximum(hd, 0.0)

    # Linear(20, 1): VPU multiply + lane reduction (no degenerate N=1 matmul)
    fw2t = rows(O_FW2T, 1)[:, :N_HID]                           # [1, 20]
    fb2 = rows(O_FB2, 1)[:, :1]                                 # [1, 1]
    e1 = jnp.sum(hd * fw2t, axis=1, keepdims=True) + fb2        # [nb, 1]

    # ---------------- Energy wrapper math ----------------
    v_row = rows(O_V, 1)                                        # [1, L]
    dx = rows(O_DX, 1)[:, :1]                                   # [1, 1]
    xv = x_dec * v_row
    s_xv = jnp.sum(xv, axis=1, keepdims=True)                   # [nb, 1]
    e2 = s_xv * dx                                              # dx * einsum('ai,i->a', x, v)
    norm = jnp.sum(x_dec, axis=1, keepdims=True) * dx           # dx * sum(x, axis=1)
    e2_trapz = (s_xv - 0.5 * (xv[:, 0:1] + xv[:, L - 1:L])) * dx   # trapezoid rule

    # lane-dense scalar block: lane 0 = e1+e2, lane 1 = e1+e2_trapz, lane 2 = norm
    lane_s = lax.broadcasted_iota(jnp.int32, (nb, OUT_W - L), 1)
    scal = jnp.where(lane_s == 0, e1 + e2, 0.0)
    scal = jnp.where(lane_s == 1, e1 + e2_trapz, scal)
    scal = jnp.where(lane_s == 2, norm, scal)

    out_ref[:, :L] = x_dec                                      # lanes 0..255 (aligned)
    out_ref[:, L:] = scal                                       # lanes 256..383 (aligned)


# ---------------- host-side (one-time) parameter packing ----------------
def _pack_conv_cat(w, bias, batch):
    """Conv1d params -> fused tap-mixing matrix matching the [c*batch + b, L] packing.
    w [cout, cin, K], bias [cout] -> [cout*batch, K*cin*batch + 1] (last column = bias)."""
    w = np.asarray(w, np.float32)
    bias = np.asarray(bias, np.float32)
    eye = np.eye(batch, dtype=np.float32)
    blocks = [np.kron(w[:, :, k], eye) for k in range(K)]       # each [cout*B, cin*B]
    bcol = np.repeat(bias, batch)[:, None]
    return np.concatenate(blocks + [bcol], axis=1)


def pack_params(p, v, dx, batch):
    """Pack all weights/biases + v + dx into ONE lane-dense [SLAB_ROWS, L] f32 slab
    (single HBM->VMEM DMA).  Must be re-packed if the batch size changes."""
    assert batch == NB, "weight slab is packed for a fixed batch size"
    slab = np.zeros((SLAB_ROWS, L), np.float32)

    def put(off, arr):
        a = np.asarray(arr, np.float32)
        if a.ndim == 1:
            a = a[None, :]
        slab[off:off + a.shape[0], :a.shape[1]] = a

    put(O_WD0, p['wd0']); put(O_BD0, p['bd0'])
    put(O_WD1, p['wd1']); put(O_BD1, p['bd1'])
    put(O_WD2, p['wd2']); put(O_BD2, p['bd2'])
    for i, off in enumerate([O_A1, O_A2, O_A3, O_A4, O_A5], start=1):
        put(off, _pack_conv_cat(p[f'cw{i}'], p[f'cb{i}'], batch))
    # fw1 [HC*L, 20], channel-major flatten (c*L + l)  ->  HC lane-dense [20, L] blocks
    fw1 = np.asarray(p['fw1'], np.float32).reshape(HC, L, N_HID)
    for c in range(HC):
        put(O_FW1 + c * FW1_STRIDE, fw1[c].T)
    put(O_FB1, p['fb1'])
    put(O_FW2T, np.asarray(p['fw2'], np.float32).reshape(1, N_HID))
    put(O_FB2, np.asarray(p['fb2'], np.float32).reshape(1, 1))
    put(O_V, v)
    put(O_DX, np.asarray([[dx]], np.float32))
    return jnp.asarray(slab)


@jax.jit
def energy_forward(z, w_slab):
    """Pallas forward of Energy(F_universal=DFTVAEDense, v, dx).
    Returns (eng_1 + eng_2, eng_1 + eng_2_trapz, norm, x), matching the PyTorch module."""
    z2d = z.reshape(z.shape[0], -1).astype(jnp.float32)         # [B, LATENT]  (CIN == 1)
    vmem = lambda: pl.BlockSpec(memory_space=pltpu.MemorySpace.VMEM)
    out = pl.pallas_call(
        energy_kernel,
        out_shape=jax.ShapeDtypeStruct((z2d.shape[0], OUT_W), jnp.float32),
        in_specs=[vmem(), vmem()],
        out_specs=vmem(),
    )(z2d, w_slab)
    return out[:, L], out[:, L + 1], out[:, L + 2], out[:, :L]


# ---------------- init + pure-JAX reference ----------------
def init_params(key):
    def u(k, shape, scale):
        return jax.random.uniform(k, shape, jnp.float32, -scale, scale)

    ks = jax.random.split(key, 32)
    p = {}
    # decoder: Linear(LATENT, H1), ReLU, Linear(H1, H0), ReLU, Linear(H0, L)
    p['wd0'] = u(ks[0], (LATENT, H1), 1.0 / np.sqrt(LATENT))
    p['bd0'] = u(ks[1], (H1,), 1.0 / np.sqrt(LATENT))
    p['wd1'] = u(ks[2], (H1, H0), 1.0 / np.sqrt(H1))
    p['bd1'] = u(ks[3], (H0,), 1.0 / np.sqrt(H1))
    p['wd2'] = u(ks[4], (H0, L), 1.0 / np.sqrt(H0))
    p['bd2'] = u(ks[5], (L,), 1.0 / np.sqrt(H0))
    # 5 conv layers of the DFT model
    p['cw1'] = u(ks[6], (HC, CIN, K), 1.0 / np.sqrt(CIN * K))
    p['cb1'] = u(ks[7], (HC,), 1.0 / np.sqrt(CIN * K))
    for i in range(2, 6):
        p[f'cw{i}'] = u(ks[6 + 2 * (i - 1)], (HC, HC, K), 1.0 / np.sqrt(HC * K))
        p[f'cb{i}'] = u(ks[7 + 2 * (i - 1)], (HC,), 1.0 / np.sqrt(HC * K))
    # final dense: Linear(HC*256, 20), ReLU, Linear(20, 1)
    p['fw1'] = u(ks[20], (HC * L, N_HID), 1.0 / np.sqrt(HC * L))
    p['fb1'] = u(ks[21], (N_HID,), 1.0 / np.sqrt(HC * L))
    p['fw2'] = u(ks[22], (N_HID, 1), 1.0 / np.sqrt(N_HID))
    p['fb2'] = u(ks[23], (1,), 1.0 / np.sqrt(N_HID))
    return p


def reference_energy(z, p, v, dx):
    hp = lambda a, w: jnp.dot(a, w, precision=lax.Precision.HIGHEST)
    z2d = z.reshape(z.shape[0], -1)
    h = jax.nn.relu(hp(z2d, p['wd0']) + p['bd0'])
    h = jax.nn.relu(hp(h, p['wd1']) + p['bd1'])
    x_dec = hp(h, p['wd2']) + p['bd2']                          # [B, L]
    x = x_dec[:, None, :]                                       # NCW
    for i in range(1, 6):
        x = lax.conv_general_dilated(x, p[f'cw{i}'], window_strides=(1,),
                                     padding=[(PAD, PAD)],
                                     dimension_numbers=('NCH', 'OIH', 'NCH'),
                                     precision=lax.Precision.HIGHEST)
        x = jax.nn.relu(x + p[f'cb{i}'][None, :, None])
    xf = x.reshape(x.shape[0], -1)
    hd = jax.nn.relu(hp(xf, p['fw1']) + p['fb1'])
    e1 = (hp(hd, p['fw2']) + p['fb2'])[:, 0]                    # [B]
    xv = x_dec * v[None, :]
    e2 = jnp.sum(xv, axis=1) * dx
    norm = jnp.sum(x_dec, axis=1) * dx
    e2_trapz = (jnp.sum(xv, axis=1) - 0.5 * (xv[:, 0] + xv[:, -1])) * dx
    return e1 + e2, e1 + e2_trapz, norm, x_dec


if __name__ == "__main__":
    key = jax.random.PRNGKey(0)
    kp, kz = jax.random.split(key)
    params = init_params(kp)
    z = jax.random.normal(kz, (B, CIN, LATENT), jnp.float32)    # [B, 1, LATENT]

    grid_pts = jnp.linspace(-1.0, 1.0, L, dtype=jnp.float32)
    v = 0.5 * grid_pts ** 2                                     # harmonic external potential
    dx = float(grid_pts[1] - grid_pts[0])

    # one-time host-side packing (hoisted out of the per-call path)
    w_slab = pack_params(params, np.asarray(v), dx, B)

    outs = energy_forward(z, w_slab)
    jax.block_until_ready(outs)

    refs = reference_energy(z, params, v, dx)
    for got, want in zip(outs, refs):
        np.testing.assert_allclose(np.asarray(got), np.asarray(want), rtol=5e-3, atol=5e-3)

    print("KERNEL_OK")
</pallas_src>

<mosaic_0001>
module attributes {stable_mosaic.version = 11 : i64} {
  func.func @energy_kernel(%arg0: memref<2x8xf32, #tpu.memory_space<vmem>>, %arg1: memref<248x256xf32, #tpu.memory_space<vmem>>, %arg2: memref<2x384xf32, #tpu.memory_space<vmem>>) attributes {dimension_semantics = [], scalar_prefetch = 0 : i64, scratch_operands = 0 : i64, tpu.core_type = #tpu.core_type<tc>} {
    %c0 = arith.constant 0 : index
    %c0_0 = arith.constant 0 : index
    %0 = vector.load %arg1[%c0, %c0_0] : memref<248x256xf32, #tpu.memory_space<vmem>>, vector<8x256xf32>
    %1 = vector.extract_strided_slice %0 {offsets = [0, 0], sizes = [8, 64], strides = [1, 1]} : vector<8x256xf32> to vector<8x64xf32>
    %c8 = arith.constant 8 : index
    %c0_1 = arith.constant 0 : index
    %2 = vector.load %arg1[%c8, %c0_1] : memref<248x256xf32, #tpu.memory_space<vmem>>, vector<64x256xf32>
    %3 = vector.extract_strided_slice %2 {offsets = [0, 0], sizes = [64, 32], strides = [1, 1]} : vector<64x256xf32> to vector<64x32xf32>
    %c72 = arith.constant 72 : index
    %c0_2 = arith.constant 0 : index
    %4 = vector.load %arg1[%c72, %c0_2] : memref<248x256xf32, #tpu.memory_space<vmem>>, vector<32x256xf32>
    %c240 = arith.constant 240 : index
    %c0_3 = arith.constant 0 : index
    %5 = vector.load %arg1[%c240, %c0_3] : memref<248x256xf32, #tpu.memory_space<vmem>>, vector<1x256xf32>
    %6 = vector.extract_strided_slice %5 {offsets = [0, 0], sizes = [1, 64], strides = [1, 1]} : vector<1x256xf32> to vector<1x64xf32>
    %c241 = arith.constant 241 : index
    %c0_4 = arith.constant 0 : index
    %7 = vector.load %arg1[%c241, %c0_4] : memref<248x256xf32, #tpu.memory_space<vmem>>, vector<1x256xf32>
    %8 = vector.extract_strided_slice %7 {offsets = [0, 0], sizes = [1, 32], strides = [1, 1]} : vector<1x256xf32> to vector<1x32xf32>
    %c242 = arith.constant 242 : index
    %c0_5 = arith.constant 0 : index
    %9 = vector.load %arg1[%c242, %c0_5] : memref<248x256xf32, #tpu.memory_space<vmem>>, vector<1x256xf32>
    %c0_6 = arith.constant 0 : index
    %c0_7 = arith.constant 0 : index
    %10 = vector.load %arg0[%c0_6, %c0_7] : memref<2x8xf32, #tpu.memory_space<vmem>>, vector<2x8xf32>
    %cst = arith.constant dense<0.000000e+00> : vector<2x64xf32>
    %11 = tpu.matmul %10, %1, %cst {dimension_numbers = #tpu.dot_dimension_numbers<[1], [0], [0], [1], [0, 0, 1, 1], [], []>} : vector<2x8xf32>, vector<8x64xf32>, vector<2x64xf32> -> vector<2x64xf32>
    %12 = vector.broadcast %6 : vector<1x64xf32> to vector<2x64xf32>
    %13 = arith.addf %11, %12 : vector<2x64xf32>
    %cst_8 = arith.constant 0.000000e+00 : f32
    %14 = vector.broadcast %cst_8 : f32 to vector<2x64xf32>
    %15 = arith.maximumf %13, %14 : vector<2x64xf32>
    %cst_9 = arith.constant dense<0.000000e+00> : vector<2x32xf32>
    %16 = tpu.matmul %15, %3, %cst_9 {dimension_numbers = #tpu.dot_dimension_numbers<[1], [0], [0], [1], [0, 0, 1, 1], [], []>} : vector<2x64xf32>, vector<64x32xf32>, vector<2x32xf32> -> vector<2x32xf32>
    %17 = vector.broadcast %8 : vector<1x32xf32> to vector<2x32xf32>
    %18 = arith.addf %16, %17 : vector<2x32xf32>
    %cst_10 = arith.constant 0.000000e+00 : f32
    %19 = vector.broadcast %cst_10 : f32 to vector<2x32xf32>
    %20 = arith.maximumf %18, %19 : vector<2x32xf32>
    %cst_11 = arith.constant dense<0.000000e+00> : vector<2x256xf32>
    %21 = tpu.matmul %20, %4, %cst_11 {dimension_numbers = #tpu.dot_dimension_numbers<[1], [0], [0], [1], [0, 0, 1, 1], [], []>} : vector<2x32xf32>, vector<32x256xf32>, vector<2x256xf32> -> vector<2x256xf32>
    %22 = vector.broadcast %9 : vector<1x256xf32> to vector<2x256xf32>
    %23 = arith.addf %21, %22 : vector<2x256xf32>
    %24 = tpu.iota {dimensions = array<i32: 1>} : vector<1x256xi32>
    %c1_i32 = arith.constant 1 : i32
    %25 = vector.broadcast %c1_i32 : i32 to vector<1x256xi32>
    %26 = arith.cmpi sge, %24, %25 : vector<1x256xi32>
    %27 = arith.extui %26 : vector<1x256xi1> to vector<1x256xi32>
    %28 = arith.sitofp %27 : vector<1x256xi32> to vector<1x256xf32>
    %c255_i32 = arith.constant 255 : i32
    %29 = vector.broadcast %c255_i32 : i32 to vector<1x256xi32>
    %30 = arith.cmpi slt, %24, %29 : vector<1x256xi32>
    %31 = arith.extui %30 : vector<1x256xi1> to vector<1x256xi32>
    %32 = arith.sitofp %31 : vector<1x256xi32> to vector<1x256xf32>
    %cst_12 = arith.constant 1.000000e+00 : f32
    %33 = vector.broadcast %cst_12 : f32 to vector<1x256xf32>
    %c1_i32_13 = arith.constant 1 : i32
    %34 = tpu.dynamic_rotate %23 by %c1_i32_13 dim 1 : vector<2x256xf32>, i32 -> vector<2x256xf32>
    %35 = vector.broadcast %28 : vector<1x256xf32> to vector<2x256xf32>
    %36 = arith.mulf %34, %35 : vector<2x256xf32>
    %c255_i32_14 = arith.constant 255 : i32
    %37 = tpu.dynamic_rotate %23 by %c255_i32_14 dim 1 : vector<2x256xf32>, i32 -> vector<2x256xf32>
    %38 = vector.broadcast %32 : vector<1x256xf32> to vector<2x256xf32>
    %39 = arith.mulf %37, %38 : vector<2x256xf32>
    %40 = tpu.concatenate %36, %23, %39, %33 in 0 : vector<2x256xf32>, vector<2x256xf32>, vector<2x256xf32>, vector<1x256xf32> -> vector<7x256xf32>
    %c104 = arith.constant 104 : index
    %c0_15 = arith.constant 0 : index
    %41 = vector.load %arg1[%c104, %c0_15] : memref<248x256xf32, #tpu.memory_space<vmem>>, vector<8x256xf32>
    %42 = vector.extract_strided_slice %41 {offsets = [0, 0], sizes = [8, 7], strides = [1, 1]} : vector<8x256xf32> to vector<8x7xf32>
    %cst_16 = arith.constant dense<0.000000e+00> : vector<8x256xf32>
    %43 = tpu.matmul %42, %40, %cst_16 {dimension_numbers = #tpu.dot_dimension_numbers<[1], [0], [0], [1], [0, 0, 1, 1], [], []>} : vector<8x7xf32>, vector<7x256xf32>, vector<8x256xf32> -> vector<8x256xf32>
    %cst_17 = arith.constant 0.000000e+00 : f32
    %44 = vector.broadcast %cst_17 : f32 to vector<8x256xf32>
    %45 = arith.maximumf %43, %44 : vector<8x256xf32>
    %c1_i32_18 = arith.constant 1 : i32
    %46 = tpu.dynamic_rotate %45 by %c1_i32_18 dim 1 : vector<8x256xf32>, i32 -> vector<8x256xf32>
    %47 = vector.broadcast %28 : vector<1x256xf32> to vector<8x256xf32>
    %48 = arith.mulf %46, %47 : vector<8x256xf32>
    %c255_i32_19 = arith.constant 255 : i32
    %49 = tpu.dynamic_rotate %45 by %c255_i32_19 dim 1 : vector<8x256xf32>, i32 -> vector<8x256xf32>
    %50 = vector.broadcast %32 : vector<1x256xf32> to vector<8x256xf32>
    %51 = arith.mulf %49, %50 : vector<8x256xf32>
    %52 = tpu.concatenate %48, %45, %51, %33 in 0 : vector<8x256xf32>, vector<8x256xf32>, vector<8x256xf32>, vector<1x256xf32> -> vector<25x256xf32>
    %c112 = arith.constant 112 : index
    %c0_20 = arith.constant 0 : index
    %53 = vector.load %arg1[%c112, %c0_20] : memref<248x256xf32, #tpu.memory_space<vmem>>, vector<8x256xf32>
    %54 = vector.extract_strided_slice %53 {offsets = [0, 0], sizes = [8, 25], strides = [1, 1]} : vector<8x256xf32> to vector<8x25xf32>
    %cst_21 = arith.constant dense<0.000000e+00> : vector<8x256xf32>
    %55 = tpu.matmul %54, %52, %cst_21 {dimension_numbers = #tpu.dot_dimension_numbers<[1], [0], [0], [1], [0, 0, 1, 1], [], []>} : vector<8x25xf32>, vector<25x256xf32>, vector<8x256xf32> -> vector<8x256xf32>
    %cst_22 = arith.constant 0.000000e+00 : f32
    %56 = vector.broadcast %cst_22 : f32 to vector<8x256xf32>
    %57 = arith.maximumf %55, %56 : vector<8x256xf32>
    %c1_i32_23 = arith.constant 1 : i32
    %58 = tpu.dynamic_rotate %57 by %c1_i32_23 dim 1 : vector<8x256xf32>, i32 -> vector<8x256xf32>
    %59 = vector.broadcast %28 : vector<1x256xf32> to vector<8x256xf32>
    %60 = arith.mulf %58, %59 : vector<8x256xf32>
    %c255_i32_24 = arith.constant 255 : i32
    %61 = tpu.dynamic_rotate %57 by %c255_i32_24 dim 1 : vector<8x256xf32>, i32 -> vector<8x256xf32>
    %62 = vector.broadcast %32 : vector<1x256xf32> to vector<8x256xf32>
    %63 = arith.mulf %61, %62 : vector<8x256xf32>
    %64 = tpu.concatenate %60, %57, %63, %33 in 0 : vector<8x256xf32>, vector<8x256xf32>, vector<8x256xf32>, vector<1x256xf32> -> vector<25x256xf32>
    %c120 = arith.constant 120 : index
    %c0_25 = arith.constant 0 : index
    %65 = vector.load %arg1[%c120, %c0_25] : memref<248x256xf32, #tpu.memory_space<vmem>>, vector<8x256xf32>
    %66 = vector.extract_strided_slice %65 {offsets = [0, 0], sizes = [8, 25], strides = [1, 1]} : vector<8x256xf32> to vector<8x25xf32>
    %cst_26 = arith.constant dense<0.000000e+00> : vector<8x256xf32>
    %67 = tpu.matmul %66, %64, %cst_26 {dimension_numbers = #tpu.dot_dimension_numbers<[1], [0], [0], [1], [0, 0, 1, 1], [], []>} : vector<8x25xf32>, vector<25x256xf32>, vector<8x256xf32> -> vector<8x256xf32>
    %cst_27 = arith.constant 0.000000e+00 : f32
    %68 = vector.broadcast %cst_27 : f32 to vector<8x256xf32>
    %69 = arith.maximumf %67, %68 : vector<8x256xf32>
    %c1_i32_28 = arith.constant 1 : i32
    %70 = tpu.dynamic_rotate %69 by %c1_i32_28 dim 1 : vector<8x256xf32>, i32 -> vector<8x256xf32>
    %71 = vector.broadcast %28 : vector<1x256xf32> to vector<8x256xf32>
    %72 = arith.mulf %70, %71 : vector<8x256xf32>
    %c255_i32_29 = arith.constant 255 : i32
    %73 = tpu.dynamic_rotate %69 by %c255_i32_29 dim 1 : vector<8x256xf32>, i32 -> vector<8x256xf32>
    %74 = vector.broadcast %32 : vector<1x256xf32> to vector<8x256xf32>
    %75 = arith.mulf %73, %74 : vector<8x256xf32>
    %76 = tpu.concatenate %72, %69, %75, %33 in 0 : vector<8x256xf32>, vector<8x256xf32>, vector<8x256xf32>, vector<1x256xf32> -> vector<25x256xf32>
    %c128 = arith.constant 128 : index
    %c0_30 = arith.constant 0 : index
    %77 = vector.load %arg1[%c128, %c0_30] : memref<248x256xf32, #tpu.memory_space<vmem>>, vector<8x256xf32>
    %78 = vector.extract_strided_slice %77 {offsets = [0, 0], sizes = [8, 25], strides = [1, 1]} : vector<8x256xf32> to vector<8x25xf32>
    %cst_31 = arith.constant dense<0.000000e+00> : vector<8x256xf32>
    %79 = tpu.matmul %78, %76, %cst_31 {dimension_numbers = #tpu.dot_dimension_numbers<[1], [0], [0], [1], [0, 0, 1, 1], [], []>} : vector<8x25xf32>, vector<25x256xf32>, vector<8x256xf32> -> vector<8x256xf32>
    %cst_32 = arith.constant 0.000000e+00 : f32
    %80 = vector.broadcast %cst_32 : f32 to vector<8x256xf32>
    %81 = arith.maximumf %79, %80 : vector<8x256xf32>
    %c1_i32_33 = arith.constant 1 : i32
    %82 = tpu.dynamic_rotate %81 by %c1_i32_33 dim 1 : vector<8x256xf32>, i32 -> vector<8x256xf32>
    %83 = vector.broadcast %28 : vector<1x256xf32> to vector<8x256xf32>
    %84 = arith.mulf %82, %83 : vector<8x256xf32>
    %c255_i32_34 = arith.constant 255 : i32
    %85 = tpu.dynamic_rotate %81 by %c255_i32_34 dim 1 : vector<8x256xf32>, i32 -> vector<8x256xf32>
    %86 = vector.broadcast %32 : vector<1x256xf32> to vector<8x256xf32>
    %87 = arith.mulf %85, %86 : vector<8x256xf32>
    %88 = tpu.concatenate %84, %81, %87, %33 in 0 : vector<8x256xf32>, vector<8x256xf32>, vector<8x256xf32>, vector<1x256xf32> -> vector<25x256xf32>
    %c136 = arith.constant 136 : index
    %c0_35 = arith.constant 0 : index
    %89 = vector.load %arg1[%c136, %c0_35] : memref<248x256xf32, #tpu.memory_space<vmem>>, vector<8x256xf32>
    %90 = vector.extract_strided_slice %89 {offsets = [0, 0], sizes = [8, 25], strides = [1, 1]} : vector<8x256xf32> to vector<8x25xf32>
    %cst_36 = arith.constant dense<0.000000e+00> : vector<8x256xf32>
    %91 = tpu.matmul %90, %88, %cst_36 {dimension_numbers = #tpu.dot_dimension_numbers<[1], [0], [0], [1], [0, 0, 1, 1], [], []>} : vector<8x25xf32>, vector<25x256xf32>, vector<8x256xf32> -> vector<8x256xf32>
    %cst_37 = arith.constant 0.000000e+00 : f32
    %92 = vector.broadcast %cst_37 : f32 to vector<8x256xf32>
    %93 = arith.maximumf %91, %92 : vector<8x256xf32>
    %c243 = arith.constant 243 : index
    %c0_38 = arith.constant 0 : index
    %94 = vector.load %arg1[%c243, %c0_38] : memref<248x256xf32, #tpu.memory_space<vmem>>, vector<1x256xf32>
    %95 = vector.extract_strided_slice %94 {offsets = [0, 0], sizes = [1, 20], strides = [1, 1]} : vector<1x256xf32> to vector<1x20xf32>
    %c144 = arith.constant 144 : index
    %c0_39 = arith.constant 0 : index
    %96 = vector.load %arg1[%c144, %c0_39] : memref<248x256xf32, #tpu.memory_space<vmem>>, vector<20x256xf32>
    %97 = vector.extract_strided_slice %93 {offsets = [0, 0], sizes = [2, 256], strides = [1, 1]} : vector<8x256xf32> to vector<2x256xf32>
    %cst_40 = arith.constant dense<0.000000e+00> : vector<2x20xf32>
    %98 = tpu.matmul %97, %96, %cst_40 {dimension_numbers = #tpu.dot_dimension_numbers<[1], [1], [0], [0], [0, 0, 1, 0], [], []>} : vector<2x256xf32>, vector<20x256xf32>, vector<2x20xf32> -> vector<2x20xf32>
    %99 = vector.broadcast %95 : vector<1x20xf32> to vector<2x20xf32>
    %100 = arith.addf %99, %98 : vector<2x20xf32>
    %c168 = arith.constant 168 : index
    %c0_41 = arith.constant 0 : index
    %101 = vector.load %arg1[%c168, %c0_41] : memref<248x256xf32, #tpu.memory_space<vmem>>, vector<20x256xf32>
    %102 = vector.extract_strided_slice %93 {offsets = [2, 0], sizes = [2, 256], strides = [1, 1]} : vector<8x256xf32> to vector<2x256xf32>
    %cst_42 = arith.constant dense<0.000000e+00> : vector<2x20xf32>
    %103 = tpu.matmul %102, %101, %cst_42 {dimension_numbers = #tpu.dot_dimension_numbers<[1], [1], [0], [0], [0, 0, 1, 0], [], []>} : vector<2x256xf32>, vector<20x256xf32>, vector<2x20xf32> -> vector<2x20xf32>
    %104 = arith.addf %100, %103 : vector<2x20xf32>
    %c192 = arith.constant 192 : index
    %c0_43 = arith.constant 0 : index
    %105 = vector.load %arg1[%c192, %c0_43] : memref<248x256xf32, #tpu.memory_space<vmem>>, vector<20x256xf32>
    %106 = vector.extract_strided_slice %93 {offsets = [4, 0], sizes = [2, 256], strides = [1, 1]} : vector<8x256xf32> to vector<2x256xf32>
    %cst_44 = arith.constant dense<0.000000e+00> : vector<2x20xf32>
    %107 = tpu.matmul %106, %105, %cst_44 {dimension_numbers = #tpu.dot_dimension_numbers<[1], [1], [0], [0], [0, 0, 1, 0], [], []>} : vector<2x256xf32>, vector<20x256xf32>, vector<2x20xf32> -> vector<2x20xf32>
    %108 = arith.addf %104, %107 : vector<2x20xf32>
    %c216 = arith.constant 216 : index
    %c0_45 = arith.constant 0 : index
    %109 = vector.load %arg1[%c216, %c0_45] : memref<248x256xf32, #tpu.memory_space<vmem>>, vector<20x256xf32>
    %110 = vector.extract_strided_slice %93 {offsets = [6, 0], sizes = [2, 256], strides = [1, 1]} : vector<8x256xf32> to vector<2x256xf32>
    %cst_46 = arith.constant dense<0.000000e+00> : vector<2x20xf32>
    %111 = tpu.matmul %110, %109, %cst_46 {dimension_numbers = #tpu.dot_dimension_numbers<[1], [1], [0], [0], [0, 0, 1, 0], [], []>} : vector<2x256xf32>, vector<20x256xf32>, vector<2x20xf32> -> vector<2x20xf32>
    %112 = arith.addf %108, %111 : vector<2x20xf32>
    %cst_47 = arith.constant 0.000000e+00 : f32
    %113 = vector.broadcast %cst_47 : f32 to vector<2x20xf32>
    %114 = arith.maximumf %112, %113 : vector<2x20xf32>
    %c244 = arith.constant 244 : index
    %c0_48 = arith.constant 0 : index
    %115 = vector.load %arg1[%c244, %c0_48] : memref<248x256xf32, #tpu.memory_space<vmem>>, vector<1x256xf32>
    %116 = vector.extract_strided_slice %115 {offsets = [0, 0], sizes = [1, 20], strides = [1, 1]} : vector<1x256xf32> to vector<1x20xf32>
    %c245 = arith.constant 245 : index
    %c0_49 = arith.constant 0 : index
    %117 = vector.load %arg1[%c245, %c0_49] : memref<248x256xf32, #tpu.memory_space<vmem>>, vector<1x256xf32>
    %118 = vector.extract_strided_slice %117 {offsets = [0, 0], sizes = [1, 1], strides = [1, 1]} : vector<1x256xf32> to vector<1x1xf32>
    %119 = vector.broadcast %116 : vector<1x20xf32> to vector<2x20xf32>
    %120 = arith.mulf %114, %119 : vector<2x20xf32>
    %cst_50 = arith.constant dense<0.000000e+00> : vector<2xf32>
    %121 = vector.multi_reduction <add>, %120, %cst_50 [1] : vector<2x20xf32> to vector<2xf32>
    %122 = vector.shape_cast %121 : vector<2xf32> to vector<2x1xf32>
    %123 = vector.broadcast %118 : vector<1x1xf32> to vector<2x1xf32>
    %124 = arith.addf %122, %123 : vector<2x1xf32>
    %c246 = arith.constant 246 : index
    %c0_51 = arith.constant 0 : index
    %125 = vector.load %arg1[%c246, %c0_51] : memref<248x256xf32, #tpu.memory_space<vmem>>, vector<1x256xf32>
    %c247 = arith.constant 247 : index
    %c0_52 = arith.constant 0 : index
    %126 = vector.load %arg1[%c247, %c0_52] : memref<248x256xf32, #tpu.memory_space<vmem>>, vector<1x256xf32>
    %127 = vector.extract_strided_slice %126 {offsets = [0, 0], sizes = [1, 1], strides = [1, 1]} : vector<1x256xf32> to vector<1x1xf32>
    %128 = vector.broadcast %125 : vector<1x256xf32> to vector<2x256xf32>
    %129 = arith.mulf %23, %128 : vector<2x256xf32>
    %cst_53 = arith.constant dense<0.000000e+00> : vector<2xf32>
    %130 = vector.multi_reduction <add>, %129, %cst_53 [1] : vector<2x256xf32> to vector<2xf32>
    %131 = vector.shape_cast %130 : vector<2xf32> to vector<2x1xf32>
    %132 = vector.broadcast %127 : vector<1x1xf32> to vector<2x1xf32>
    %133 = arith.mulf %131, %132 : vector<2x1xf32>
    %cst_54 = arith.constant dense<0.000000e+00> : vector<2xf32>
    %134 = vector.multi_reduction <add>, %23, %cst_54 [1] : vector<2x256xf32> to vector<2xf32>
    %135 = vector.shape_cast %134 : vector<2xf32> to vector<2x1xf32>
    %136 = vector.broadcast %127 : vector<1x1xf32> to vector<2x1xf32>
    %137 = arith.mulf %135, %136 : vector<2x1xf32>
    %138 = vector.extract_strided_slice %129 {offsets = [0, 0], sizes = [2, 1], strides = [1, 1]} : vector<2x256xf32> to vector<2x1xf32>
    %139 = vector.extract_strided_slice %129 {offsets = [0, 255], sizes = [2, 1], strides = [1, 1]} : vector<2x256xf32> to vector<2x1xf32>
    %140 = arith.addf %138, %139 : vector<2x1xf32>
    %cst_55 = arith.constant 5.000000e-01 : f32
    %141 = vector.broadcast %cst_55 : f32 to vector<2x1xf32>
    %142 = arith.mulf %141, %140 : vector<2x1xf32>
    %143 = arith.subf %131, %142 : vector<2x1xf32>
    %144 = vector.broadcast %127 : vector<1x1xf32> to vector<2x1xf32>
    %145 = arith.mulf %143, %144 : vector<2x1xf32>
    %146 = tpu.iota {dimensions = array<i32: 1>} : vector<2x128xi32>
    %c0_i32 = arith.constant 0 : i32
    %147 = vector.broadcast %c0_i32 : i32 to vector<2x128xi32>
    %148 = arith.cmpi eq, %146, %147 : vector<2x128xi32>
    %149 = arith.addf %124, %133 : vector<2x1xf32>
    %cst_56 = arith.constant 0.000000e+00 : f32
    %150 = vector.shape_cast %149 : vector<2x1xf32> to vector<2x1xf32>
    %151 = vector.broadcast %150 : vector<2x1xf32> to vector<2x128xf32>
    %152 = vector.broadcast %cst_56 : f32 to vector<2x128xf32>
    %153 = arith.select %148, %151, %152 : vector<2x128xi1>, vector<2x128xf32>
    %c1_i32_57 = arith.constant 1 : i32
    %154 = vector.broadcast %c1_i32_57 : i32 to vector<2x128xi32>
    %155 = arith.cmpi eq, %146, %154 : vector<2x128xi32>
    %156 = arith.addf %124, %145 : vector<2x1xf32>
    %157 = vector.shape_cast %156 : vector<2x1xf32> to vector<2x1xf32>
    %158 = vector.broadcast %157 : vector<2x1xf32> to vector<2x128xf32>
    %159 = arith.select %155, %158, %153 : vector<2x128xi1>, vector<2x128xf32>
    %c2_i32 = arith.constant 2 : i32
    %160 = vector.broadcast %c2_i32 : i32 to vector<2x128xi32>
    %161 = arith.cmpi eq, %146, %160 : vector<2x128xi32>
    %162 = vector.shape_cast %137 : vector<2x1xf32> to vector<2x1xf32>
    %163 = vector.broadcast %162 : vector<2x1xf32> to vector<2x128xf32>
    %164 = arith.select %161, %163, %159 : vector<2x128xi1>, vector<2x128xf32>
    %c0_58 = arith.constant 0 : index
    %c0_59 = arith.constant 0 : index
    %165 = vector.load %arg2[%c0_58, %c0_59] : memref<2x384xf32, #tpu.memory_space<vmem>>, vector<2x256xf32>
    tpu.vector_store %arg2[%c0_58, %c0_59], %23 {strides = array<i32>} : memref<2x384xf32, #tpu.memory_space<vmem>>, vector<2x256xf32>,
    %c0_60 = arith.constant 0 : index
    %c256 = arith.constant 256 : index
    %166 = vector.load %arg2[%c0_60, %c256] : memref<2x384xf32, #tpu.memory_space<vmem>>, vector<2x128xf32>
    tpu.vector_store %arg2[%c0_60, %c256], %164 {strides = array<i32>} : memref<2x384xf32, #tpu.memory_space<vmem>>, vector<2x128xf32>,
    return
  }
}

</mosaic_0001>

<bundles_post_ra>
// kernel: energy_forward.1
= control target key start
LH: loop header
LB: loop body
LE: loop exit
PB: predicated region body
PF: predicated region fallthrough
CT: control target
= control target key end

     0   :  { %7 = vsyncpa [#allocation3], 0  ;;  %s1423_s9 = smov [#allocation2]   ;;  %s1640_s0 = inlined_call_operand.vmem [shape: f32[2,8], index: 0, kind: input, shape index: {}]   ;;  %s1641_s1 = inlined_call_operand.hbm [shape: f32[248,256], index: 1, kind: input, shape index: {}]   ;;  %s1642_s2 = inlined_call_operand.vmem [shape: f32[2,384], index: 2, kind: output, shape index: {}]  }
   0x1   :  { %s15_s10 = sshll.u32 %s1423_s9, 4  ;;  %s1399_s13 = scalar_lea.hbm %s1641_s1, 7936  ;;  %s16_s10 = int_to_ptr.vmem [resolvable:$true] %s15_s10 }
   0x2   :  { %p1400_p0 = scmp.ne.s32.totalorder %s1641_s1, %s1399_s13  ;;  %p1403_p1 = scmp.lt.u32.totalorder %s1399_s13, %s1641_s1 }
   0x4   :  { %p1405_p2 = pnand %p1403_p1, %p1400_p0 }
   0x6   :  { %1408 = shalt.err (!%p1405_p2)
}
   0x7   :  { %s1409_s18 = scalar_lea.vmem %s16_s10, 7936  ;;  %p1414_p4 = scmp.lt.s32.totalorder %s16_s10, %s16_s10 }
   0x8   :  { %p1410_p3 = scmp.ne.s32.totalorder %s16_s10, %s1409_s18  ;;  %p1415_p5 = scmp.lt.s32.totalorder %s1409_s18, %s1409_s18 }
   0xa   :  { %p1416_p6 = por %p1415_p5, %p1414_p4 }
   0xc   :  { %p1417_p7 = pnand %p1416_p6, %p1410_p3 }
   0xe   :  { %1420 = shalt.err (!%p1417_p7)
}
   0xf   :  { %s1424_s19 = smov 256   ;;  %s1425_s20 = smov 16  }
  0x10   :  { %21 = dma.hbm_to_vmem [thread:$0]  %s1641_s1, 7936, %s16_s10, [#allocation3], %s1424_s19, %s1424_s19, %s1425_s20  }
  0x11   :  { %1421 = dma.done.wait [#allocation3], 7936  }
  0x12   :  { %1422 = vsyncadd [#allocation3], 4294959360  ;;  %v1426_v0 = vmov 0.0   ;;  %vm1427_vm0 = vmmov 0   ;;  %v1428_v1 = vmov 0.0|0.0   ;;  %vm55_vm1 = vcmask 64512  }
  0x13   :  { %1280 = vmatprep.subr.mxu0 %v1426_v0  ;;  %1282 = vmatprep.mubr.msk.f32.mxu0 %vm1427_vm0, %v1426_v0  ;;  %v25_v2 = vld [vmem:[#allocation2] sm:$0xff]  ;;  %v26_v4 = vld [vmem:[#allocation2 + $0x10] sm:$0xff]  ;;  %v35_v16 = vld [vmem:[#allocation2 + $0x98] sm:$0xff]  ;;  %v50_v22 = vlaneseq  ;;  %vm136_vm2 = vcmask 523264   ;;  %vm222_vm3 = vcmask 261120   ;;  %vm342_vm4 = vcmask 1041408  }
  0x14   :  { %1304 = vmatprep.subr.bf16.mxu1 %v1428_v1  ;;  %1301 = vmatprep.mubr.msk.f32.mxu1 %vm1427_vm0, %v1426_v0  ;;  %v48_v3 = vld [vmem:[%s1640_s0] sm:$0x3]  ;;  %v28_v6 = vld [vmem:[#allocation2 + $0x30] sm:$0xff]  ;;  %v37_v17 = vld [vmem:[#allocation2 + $0xa8] sm:$0xff]  ;;  %s1429_s0 = smov 1   ;;  %s1430_s1 = smov 127  }
  0x15   :  { %1281 = vmatpush3.msra.mxu0 %v25_v2  ;;  %v27_v5 = vld [vmem:[#allocation2 + $0x20] sm:$0xff]  ;;  %v30_v10 = vld [vmem:[#allocation2 + $0x50] sm:$0xff]  ;;  %v1316_v19 = vpack.c.bf16 %v37_v17, %v35_v16  ;;  %v51_v23 = vshrl.u32 %v50_v22, 7  ;;  %v39_v31 = vld [vmem:[#allocation2 + $0xb8] sm:$0xff]  ;;  %v1497_v58 = vand.u32 127, %v50_v22  ;;  %vm345_vm9 = vcmask 1043456  }
  0x16   :  { %v29_v7 = vld [vmem:[#allocation2 + $0x40] sm:$0xff]  ;;  %1283 = vmatmul.mubr.msk.f32.vlgmr.msra.gmra.mrb[0].mxu0 %vm55_vm1, %v48_v3  ;;  %v1305_v8 = vpack.c.bf16 %v27_v5, %v26_v4  ;;  %v32_v13 = vld [vmem:[#allocation2 + $0x70] sm:$0xff]  ;;  %v41_v32 = vld [vmem:[#allocation2 + $0xc8] sm:$0xff]  ;;  %vm348_vm10 = vcmask 1045504   ;;  %vm356_vm11 = vcmask 1046528   ;;  %vm352_vm12 = vcmask 56320  }
  0x17   :  { %290 = vmatprep.mubr.f32.mxu0 %v1426_v0  ;;  %v1308_v9 = vpack.c.bf16 %v29_v7, %v28_v6  ;;  %v31_v11 = vld [vmem:[#allocation2 + $0x60] sm:$0xff]  ;;  %v34_v18 = vld [vmem:[#allocation2 + $0x90] sm:$0xff]  ;;  %1317 = vmatprep.subr.bf16.mxu0 %v1316_v19  ;;  %v1468_v24 = vsub.s32 0, %v51_v23  ;;  %v1320_v33 = vpack.c.bf16 %v41_v32, %v39_v31  ;;  %v218_v44 = vsub.s32 1, %v51_v23 }
  0x18   :  { %1306 = vmatpush3.bf16.msra.mxu1 %v1305_v8  ;;  %v1311_v12 = vpack.c.bf16 %v31_v11, %v30_v10  ;;  %v33_v14 = vld [vmem:[#allocation2 + $0x80] sm:$0xff]  ;;  %v38_v34 = vld [vmem:[#allocation2 + $0xb0] sm:$0xff]  ;;  %v299_v59 = vadd.s32 128, %v1497_v58  ;;  %vm300_vm5 = vcmp.ge.s32.totalorder %v1497_v58, 1  ;;  %vm316_vm7 = vcmp.lt.s32.totalorder %v1497_v58, 1 }
  0x19   :  { %1307 = vmatprep.subr.bf16.mxu1 %v1428_v1  ;;  %v1314_v15 = vpack.c.bf16 %v33_v14, %v32_v13  ;;  %v36_v20 = vld [vmem:[#allocation2 + $0xa0] sm:$0xff]  ;;  %vm325_vm8 = vcmp.lt.s32.totalorder %v1497_v58, 127  ;;  %v1504_v62 = vsel %vm300_vm5, 1.0, %v1426_v0  ;;  %vm457_vm13 = vcmask 1040384  }
  0x1a   :  { %v1318_v21 = vpack.c.bf16 %v36_v20, %v34_v18  ;;  %v43_v25 = vld [vmem:[#allocation2 + $0x1e0] ss:$8 sm:$0x3]  ;;  %v45_v37 = vld [vmem:[#allocation2 + $0x1e1] ss:$8 sm:$0x3] }
  0x1b   :  { %v53_v26 = vrot.slane %v43_v25, %v1468_v24  ;;  %v40_v35 = vld [vmem:[#allocation2 + $0xc0] sm:$0xff]  ;;  %v134_v38 = vrot.slane %v45_v37, %v1468_v24  ;;  %vm307_vm6 = vcmp.lt.s32.totalorder %v299_v59, 255  ;;  %v351_v18 = vld [vmem:[#allocation2 + $0xd0] sm:$0xff]  ;;  %vm1431_vm14 = vmmov 1   ;;  %v984_v37 = vld [vmem:[#allocation2 + $0x198] sm:$0xff] }
  0x1c   :  { %1309 = vmatpush3.bf16.msra.mxu1 %v1308_v9  ;;  %1319 = vmatpush1.bf16.msra.mxu0 %v1318_v21  ;;  %v1322_v36 = vpack.c.bf16 %v40_v35, %v38_v34  ;;  %v47_v43 = vld [vmem:[#allocation2 + $0x1e2] ss:$8 sm:$0x3]  ;;  %v1475_v46 = vld [vmem:[#allocation2 + $0x1e6] ss:$8 sm:$0x3]  ;;  %vm1539_vm15 = vmpackc.low %vm457_vm13, %vm1431_vm14 }
  0x1d   :  { %1310 = vmatprep.subr.bf16.mxu1 %v1428_v1  ;;  %1321 = vmatprep.subr.bf16.mxu0 %v1320_v33  ;;  %v215_v45 = vrot.slane %v47_v43, %v1468_v24  ;;  %v219_v47 = vrot.slane %v47_v43, %v218_v44  ;;  %v1178_v49 = vrot.slane %v1475_v46, %v218_v44  ;;  %v1507_v63 = vsel %vm307_vm6, 1.0, %v1426_v0 }
  0x1e   :  { %vm453_vm0 = vcmask 203776   ;;  %vm1155_vm1 = vcmask 156672  }
  0x20   :  { %1312 = vmatpush3.bf16.msra.mxu1 %v1311_v12  ;;  %1323 = vmatpush1.bf16.msra.mxu0 %v1322_v36 }
  0x21   :  { %1313 = vmatprep.subr.bf16.mxu1 %v1428_v1 }
  0x24   :  { %1315 = vmatpush3.bf16.msra.mxu1 %v1314_v15 }
  0xe9   :  { %v125_v27 = vpop.f32.mrb[0].mxu0 }
  0xea   :  { %v126_v28 = vadd.f32 %v125_v27, %v53_v26  ;;  %v1284_v29 = vpop.f32.mrb[1].mxu0 }
  0xec   :  { %v129_v30 = vmax.f32 %v126_v28, 0.0 }
  0xee   :  { %1302 = vmatmul.mubr.msk.f32.vlgmr.msra.gmra.mrb[0].mxu1 %vm136_vm2, %v129_v30  ;;  %vm1209_vm2 = vcmp.eq.s32.totalorder %v1497_v58, 0 }
  0xef   :  { %618 = vmatprep.mubr.f32.mxu1 %v1426_v0 }
 0x1c1   :  { %v206_v39 = vpop.f32.mrb[0].mxu1 }
 0x1c2   :  { %v207_v40 = vadd.f32 %v206_v39, %v134_v38  ;;  %v1303_v41 = vpop.f32.mrb[1].mxu1  ;;  %v1432_v38 = vmov 1.0  }
 0x1c3   :  { %v452_v41 = vld [vmem:[#allocation2 + $0xe0] sm:$0xff] }
 0x1c4   :  { %v210_v42 = vmax.f32 %v207_v40, 0.0 }
 0x1c6   :  { %1250 = vmatmul.mubr.msk.f32.vlgmr.msra.gmra.mrb[2].mxu0 %vm222_vm3, %v210_v42  ;;  %vm1217_vm3 = vcmp.eq.s32.totalorder %v1497_v58, 1 }
 0x1c7   :  { %427 = vmatprep.mubr.f32.mxu0 %v1426_v0 }
 0x299   :  { %v292_v48 = vpop.f32.mrb[2].mxu0 }
 0x29a   :  { %v1478_v50 = vadd.f32 %v292_v48, %v215_v45  ;;  %v294_v51 = vpop.f32.mrb[3].mxu0 }
 0x29b   :  { %v295_v52 = vadd.f32 %v294_v51, %v219_v47 }
 0x29c   :  { %312 = vrot.lane.b32.xlu1 %v1478_v50, %s1429_s0  ;;  %321 = vrot.lane.b32.xlu0 %v1478_v50, %s1430_s1  ;;  %v1195_v53 = vsel %vm342_vm4, %v1478_v50, 0.0  ;;  %v332_v4 = vrot.slane %v1478_v50, 6 }
 0x29d   :  { %v1232_v54 = vcombine.low %v1478_v50, %v295_v52  ;;  %v1487_v55 = vmul.f32 %v1178_v49, %v295_v52  ;;  %v1196_v56 = vsel %vm342_vm4, %v295_v52, 0.0  ;;  %v333_v11 = vrot.slane %v295_v52, 6 }
 0x29e   :  { %v1490_v57 = vadd.f32 %v1196_v56, %v1195_v53 }
 0x29f   :  { %1268 = vst.sshfl [vmem:[%s1642_s2] sm:$0x33 pattern:$0x76325410] %v1232_v54 }
 0x2a0   :  { %314 = vrot.lane.b32.xlu1 %v295_v52, %s1429_s0  ;;  %323 = vrot.lane.b32.xlu0 %v295_v52, %s1430_s1 }
 0x30e   :  { %v313_v60 = vpop.permute.xlu1 %312  ;;  %v322_v61 = vpop.permute.xlu0 %321 }
 0x312   :  { %v315_v1 = vpop.permute.xlu1 %314  ;;  %v324_v2 = vpop.permute.xlu0 %323 }
 0x313   :  { %v318_v3 = vsel %vm316_vm7, %v315_v1, %v313_v60  ;;  %v326_v5 = vsel %vm325_vm8, %v322_v61, %v324_v2  ;;  %v327_v6 = vsel %vm325_vm8, %v324_v2, %v322_v61  ;;  %v317_v7 = vsel %vm316_vm7, %v313_v60, %v315_v1 }
 0x314   :  { %v319_v8 = vmul.f32 %v1504_v62, %v318_v3  ;;  %v329_v9 = vmul.f32 %v1507_v63, %v327_v6  ;;  %v338_v10 = vrot.slane %v326_v5, 4  ;;  %v344_v14 = vsel %vm342_vm4, %v317_v7, %v333_v11 }
 0x316   :  { %v343_v12 = vsel %vm342_vm4, %v319_v8, %v332_v4  ;;  %v339_v13 = vrot.slane %v329_v9, 4  ;;  %v550_v4 = vld [vmem:[#allocation2 + $0xf0] sm:$0xff] }
 0x317   :  { %v346_v15 = vsel %vm345_vm9, %v343_v12, %v338_v10 }
 0x318   :  { %v347_v16 = vsel %vm345_vm9, %v344_v14, %v339_v13  ;;  %v349_v19 = vsel %vm348_vm10, %v346_v15, 1.0 }
 0x319   :  { %v350_v17 = vsel %vm348_vm10, %v347_v16, 1.0 }
 0x31a   :  { %1253 = vmatprep.subr.msk.mxu0 %vm356_vm11, %v350_v17 }
 0x31b   :  { %1254 = vmatpush1.msk.msra.mxu0 %vm356_vm11, %v349_v19 }
 0x31c   :  { %1255 = vmatmul.mubr.msk.f32.vlgmr.msra.gmra.mrb[4].mxu0 %vm352_vm12, %v351_v18 }
 0x31d   :  { %525 = vmatprep.mubr.f32.mxu0 %v1426_v0 }
 0x3ef   :  { %v429_v20 = vpop.f32.mrb[4].mxu0 }
 0x3f0   :  { %v434_v21 = vmax.f32 %v429_v20, 0.0  ;;  %v431_v22 = vpop.f32.mrb[5].mxu0 }
 0x3f1   :  { %v435_v23 = vmax.f32 %v431_v22, 0.0  ;;  %v643_v22 = vld [vmem:[#allocation2 + $0x100] sm:$0xff] }
 0x3f2   :  { %436 = vrot.lane.b32.xlu0 %v434_v21, %s1429_s0 }
 0x3f3   :  { %438 = vrot.lane.b32.xlu1 %v435_v23, %s1429_s0 }
 0x3f6   :  { %444 = vrot.lane.b32.xlu0 %v434_v21, %s1430_s1 }
 0x3f7   :  { %446 = vrot.lane.b32.xlu1 %v435_v23, %s1430_s1 }
 0x464   :  { %v437_v25 = vpop.permute.xlu0 %436 }
 0x465   :  { %v439_v26 = vpop.permute.xlu1 %438 }
 0x466   :  { %v440_v27 = vsel %vm316_vm7, %v437_v25, %v439_v26  ;;  %v441_v28 = vsel %vm316_vm7, %v439_v26, %v437_v25 }
 0x467   :  { %v442_v29 = vmul.f32 %v1504_v62, %v441_v28  ;;  %v1324_v30 = vpack.c.bf16 %v435_v23, %v440_v27  ;;  %v1174_v28 = vrot.slane %v1475_v46, %v1468_v24 }
 0x468   :  { %v445_v31 = vpop.permute.xlu0 %444 }
 0x469   :  { %v1326_v32 = vpack.c.bf16 %v434_v21, %v442_v29  ;;  %1325 = vmatprep.subr.bf16.mxu0 %v1324_v30  ;;  %v447_v33 = vpop.permute.xlu1 %446  ;;  %v1181_v29 = vmul.f32 %v1174_v28, %v1478_v50 }
 0x46a   :  { %v449_v34 = vsel %vm325_vm8, %v447_v33, %v445_v31  ;;  %v448_v35 = vsel %vm325_vm8, %v445_v31, %v447_v33  ;;  %v1184_v31 = vsel %vm342_vm4, %v1487_v55, 0.0  ;;  %v1433_v33 = vmov 0  }
 0x46b   :  { %v451_v36 = vmul.f32 %v1507_v63, %v449_v34  ;;  %1327 = vmatpush1.bf16.msra.mxu0 %v1326_v32  ;;  %v1331_v40 = vpack.c.bf16 %v1432_v38, %v448_v35  ;;  %v1183_v30 = vsel %vm342_vm4, %v1181_v29, 0.0  ;;  %1398 = vset.pattern.permute.xlu0 %v1433_v33  ;;  %vm1225_vm4 = vcmp.eq.s32.totalorder %v1497_v58, 2 }
 0x46c   :  { %v1185_v32 = vadd.f32 %v1184_v31, %v1183_v30  ;;  %1397 = vset.pattern.permute.xlu1 %v1433_v33 }
 0x46d   :  { %v1328_v39 = vpack.c.bf16 %v1432_v38, %v451_v36 }
 0x46f   :  { %1330 = vmatprep.subr.msk.bf16.mxu0 %vm1539_vm15, %v1328_v39 }
 0x470   :  { %1333 = vmatpush1.bf16.msk.msra.mxu0 %vm1539_vm15, %v1331_v40 }
 0x473   :  { %1258 = vmatmul.mubr.msk.f32.vlgmr.msra.gmra.mrb[6].mxu0 %vm453_vm0, %v452_v41 }
 0x474   :  { %711 = vmatprep.mubr.f32.mxu0 %v1426_v0 }
 0x546   :  { %v527_v42 = vpop.f32.mrb[6].mxu0 }
 0x547   :  { %v532_v43 = vmax.f32 %v527_v42, 0.0  ;;  %v529_v44 = vpop.f32.mrb[7].mxu0 }
 0x548   :  { %v533_v45 = vmax.f32 %v529_v44, 0.0 }
 0x549   :  { %534 = vrot.lane.b32.xlu0 %v532_v43, %s1429_s0 }
 0x54a   :  { %536 = vrot.lane.b32.xlu1 %v533_v45, %s1429_s0 }
 0x54d   :  { %542 = vrot.lane.b32.xlu0 %v532_v43, %s1430_s1 }
 0x54e   :  { %544 = vrot.lane.b32.xlu1 %v533_v45, %s1430_s1 }
 0x5bb   :  { %v535_v47 = vpop.permute.xlu0 %534 }
 0x5bc   :  { %v537_v48 = vpop.permute.xlu1 %536 }
 0x5bd   :  { %v538_v49 = vsel %vm316_vm7, %v535_v47, %v537_v48  ;;  %v539_v51 = vsel %vm316_vm7, %v537_v48, %v535_v47  ;;  %v1169_v47 = vld [vmem:[#allocation2 + $0x1e7] ss:$8 sm:$0x3] }
 0x5be   :  { %v540_v52 = vmul.f32 %v1504_v62, %v539_v51  ;;  %v1334_v53 = vpack.c.bf16 %v533_v45, %v538_v49  ;;  %v1192_v48 = vrot.slane %v1169_v47, %v1468_v24 }
 0x5bf   :  { %v543_v54 = vpop.permute.xlu0 %542 }
 0x5c0   :  { %v1336_v56 = vpack.c.bf16 %v532_v43, %v540_v52  ;;  %1335 = vmatprep.subr.bf16.mxu1 %v1334_v53  ;;  %v545_v59 = vpop.permute.xlu1 %544  ;;  %v816_v53 = vld [vmem:[#allocation2 + $0x128] sm:$0xff] }
 0x5c1   :  { %v547_v60 = vsel %vm325_vm8, %v545_v59, %v543_v54  ;;  %v546_v61 = vsel %vm325_vm8, %v543_v54, %v545_v59  ;;  %v818_v54 = vld [vmem:[#allocation2 + $0x138] sm:$0xff]  ;;  %v817_v59 = vld [vmem:[#allocation2 + $0x130] sm:$0xff] }
 0x5c2   :  { %v549_v1 = vmul.f32 %v1507_v63, %v547_v60  ;;  %1337 = vmatpush1.bf16.msra.mxu1 %v1336_v56  ;;  %v1341_v3 = vpack.c.bf16 %v1432_v38, %v546_v61  ;;  %v1364_v56 = vpack.c.bf16 %v818_v54, %v816_v53  ;;  %v982_v60 = vld [vmem:[#allocation2 + $0x188] sm:$0xff] }
 0x5c4   :  { %v1338_v2 = vpack.c.bf16 %v1432_v38, %v549_v1 }
 0x5c6   :  { %1340 = vmatprep.subr.msk.bf16.mxu1 %vm1539_vm15, %v1338_v2  ;;  %v1372_v2 = vpack.c.bf16 %v984_v37, %v982_v60 }
 0x5c7   :  { %1343 = vmatpush1.bf16.msk.msra.mxu1 %vm1539_vm15, %v1341_v3  ;;  %v981_v3 = vld [vmem:[#allocation2 + $0x180] sm:$0xff] }
 0x5ca   :  { %1261 = vmatmul.mubr.msk.f32.vlgmr.msra.gmra.mrb[2].mxu1 %vm453_vm0, %v550_v4  ;;  %v983_v4 = vld [vmem:[#allocation2 + $0x190] sm:$0xff] }
 0x5cb   :  { %804 = vmatprep.mubr.f32.mxu1 %v1426_v0 }
 0x69d   :  { %v620_v5 = vpop.f32.mrb[2].mxu1 }
 0x69e   :  { %v625_v6 = vmax.f32 %v620_v5, 0.0  ;;  %v622_v7 = vpop.f32.mrb[3].mxu1 }
 0x69f   :  { %v626_v8 = vmax.f32 %v622_v7, 0.0 }
 0x6a0   :  { %627 = vrot.lane.b32.xlu0 %v625_v6, %s1429_s0 }
 0x6a1   :  { %629 = vrot.lane.b32.xlu1 %v626_v8, %s1429_s0 }
 0x6a4   :  { %635 = vrot.lane.b32.xlu0 %v625_v6, %s1430_s1 }
 0x6a5   :  { %637 = vrot.lane.b32.xlu1 %v626_v8, %s1430_s1 }
 0x712   :  { %v628_v9 = vpop.permute.xlu0 %627 }
 0x713   :  { %v630_v10 = vpop.permute.xlu1 %629 }
 0x714   :  { %v631_v11 = vsel %vm316_vm7, %v628_v9, %v630_v10  ;;  %v632_v0 = vsel %vm316_vm7, %v630_v10, %v628_v9  ;;  %v820_v10 = vld [vmem:[#allocation2 + $0x148] sm:$0xf] }
 0x715   :  { %v633_v12 = vmul.f32 %v1504_v62, %v632_v0  ;;  %v1344_v13 = vpack.c.bf16 %v626_v8, %v631_v11  ;;  %v819_v11 = vld [vmem:[#allocation2 + $0x140] sm:$0xf]  ;;  %v986_v0 = vld [vmem:[#allocation2 + $0x1a8] sm:$0xf] }
 0x716   :  { %v636_v14 = vpop.permute.xlu0 %635 }
 0x717   :  { %v1346_v15 = vpack.c.bf16 %v625_v6, %v633_v12  ;;  %1345 = vmatprep.subr.bf16.mxu0 %v1344_v13  ;;  %v638_v16 = vpop.permute.xlu1 %637  ;;  %v1374_v6 = vpack.c.bf16 %v983_v4, %v981_v3  ;;  %v899_v12 = vld [vmem:[#allocation2 + $0x158] sm:$0xff]  ;;  %v901_v13 = vld [vmem:[#allocation2 + $0x168] sm:$0xff] }
 0x718   :  { %v640_v17 = vsel %vm325_vm8, %v638_v16, %v636_v14  ;;  %v639_v18 = vsel %vm325_vm8, %v636_v14, %v638_v16  ;;  %v985_v14 = vld [vmem:[#allocation2 + $0x1a0] sm:$0xf]  ;;  %v1063_v16 = vld [vmem:[#allocation2 + $0x1b8] sm:$0xff] }
 0x719   :  { %v642_v19 = vmul.f32 %v1507_v63, %v640_v17  ;;  %1347 = vmatpush1.bf16.msra.mxu0 %v1346_v15  ;;  %v1351_v21 = vpack.c.bf16 %v1432_v38, %v639_v18  ;;  %v1368_v15 = vpack.c.bf16 %v901_v13, %v899_v12  ;;  %v1065_v17 = vld [vmem:[#allocation2 + $0x1c8] sm:$0xff] }
 0x71a   :  { %v1376_v18 = vpack.c.bf16 %v1065_v17, %v1063_v16 }
 0x71b   :  { %v1348_v20 = vpack.c.bf16 %v1432_v38, %v642_v19  ;;  %v898_v19 = vld [vmem:[#allocation2 + $0x150] sm:$0xff] }
 0x71d   :  { %1350 = vmatprep.subr.msk.bf16.mxu0 %vm1539_vm15, %v1348_v20  ;;  %v900_v20 = vld [vmem:[#allocation2 + $0x160] sm:$0xff] }
 0x71e   :  { %1353 = vmatpush1.bf16.msk.msra.mxu0 %vm1539_vm15, %v1351_v21  ;;  %v1370_v28 = vpack.c.bf16 %v900_v20, %v898_v19 }
 0x71f   :  { %1373 = vmatprep.subr.bf16.mxu0 %v1372_v2 }
 0x721   :  { %1264 = vmatmul.mubr.msk.f32.vlgmr.msra.gmra.mrb[8].mxu0 %vm453_vm0, %v643_v22 }
 0x727   :  { %1375 = vmatpush1.bf16.xpose.msra.mxu0 %v1374_v6 }
 0x728   :  { %995 = vmatprep.subr.mxu0 %v986_v0 }
 0x72f   :  { %996 = vmatpush1.xpose.msra.mxu0 %v985_v14 }
 0x730   :  { %1377 = vmatprep.subr.bf16.mxu0 %v1376_v18 }
 0x7f4   :  { %v713_v23 = vpop.f32.mrb[8].mxu0 }
 0x7f5   :  { %v718_v25 = vmax.f32 %v713_v23, 0.0  ;;  %v715_v26 = vpop.f32.mrb[9].mxu0 }
 0x7f6   :  { %v719_v27 = vmax.f32 %v715_v26, 0.0  ;;  %v1064_v26 = vld [vmem:[#allocation2 + $0x1c0] sm:$0xff] }
 0x7f7   :  { %720 = vrot.lane.b32.xlu0 %v718_v25, %s1429_s0 }
 0x7f8   :  { %722 = vrot.lane.b32.xlu1 %v719_v27, %s1429_s0 }
 0x7fb   :  { %728 = vrot.lane.b32.xlu0 %v718_v25, %s1430_s1 }
 0x7fc   :  { %730 = vrot.lane.b32.xlu1 %v719_v27, %s1430_s1 }
 0x81a   :  { %1186 = vadd.xlane.f32.xlu0 %v1185_v32 }
 0x81e   :  { %1198 = vadd.xlane.f32.xlu0 %v1490_v57 }
 0x834   :  { %1202 = vrot.lane.b32.xlu0 %v1487_v55, %s1429_s0 }
 0x869   :  { %v721_v34 = vpop.permute.xlu0 %720 }
 0x86a   :  { %v723_v35 = vpop.permute.xlu1 %722 }
 0x86b   :  { %v724_v46 = vsel %vm316_vm7, %v721_v34, %v723_v35  ;;  %v725_v50 = vsel %vm316_vm7, %v723_v35, %v721_v34  ;;  %v903_v34 = vld [vmem:[#allocation2 + $0x178] sm:$0xf] }
 0x86c   :  { %v726_v36 = vmul.f32 %v1504_v62, %v725_v50  ;;  %v1354_v39 = vpack.c.bf16 %v719_v27, %v724_v46  ;;  %v736_v62 = vld [vmem:[#allocation2 + $0x110] sm:$0xff]  ;;  %v1067_v35 = vld [vmem:[#allocation2 + $0x1d8] sm:$0xf] }
 0x86d   :  { %v729_v40 = vpop.permute.xlu0 %728  ;;  %v902_v46 = vld [vmem:[#allocation2 + $0x170] sm:$0xf] }
 0x86e   :  { %v1356_v41 = vpack.c.bf16 %v718_v25, %v726_v36  ;;  %1355 = vmatprep.subr.bf16.mxu1 %v1354_v39  ;;  %v731_v57 = vpop.permute.xlu1 %730  ;;  %v1062_v25 = vld [vmem:[#allocation2 + $0x1b0] sm:$0xff] }
 0x86f   :  { %v733_v42 = vsel %vm325_vm8, %v731_v57, %v729_v40  ;;  %v732_v55 = vsel %vm325_vm8, %v729_v40, %v731_v57  ;;  %v1378_v31 = vpack.c.bf16 %v1064_v26, %v1062_v25  ;;  %v1066_v50 = vld [vmem:[#allocation2 + $0x1d0] sm:$0xf]  ;;  %v814_v40 = vld [vmem:[#allocation2 + $0x1e3] ss:$8 sm:$0x3] }
 0x870   :  { %v735_v43 = vmul.f32 %v1507_v63, %v733_v42  ;;  %1357 = vmatpush1.bf16.msra.mxu1 %v1356_v41  ;;  %v1361_v45 = vpack.c.bf16 %v1432_v38, %v732_v55  ;;  %v895_v41 = vrot.slane %v814_v40, %v1468_v24  ;;  %v1145_v42 = vld [vmem:[#allocation2 + $0x1e4] ss:$8 sm:$0x3] }
 0x871   :  { %v1152_v47 = vrot.slane %v1145_v42, %v1468_v24 }
 0x872   :  { %v1358_v44 = vpack.c.bf16 %v1432_v38, %v735_v43  ;;  %v815_v38 = vld [vmem:[#allocation2 + $0x120] sm:$0xff] }
 0x873   :  { %v1366_v1 = vpack.c.bf16 %v817_v59, %v815_v38 }
 0x874   :  { %1360 = vmatprep.subr.msk.bf16.mxu1 %vm1539_vm15, %v1358_v44 }
 0x875   :  { %1363 = vmatpush1.bf16.msk.msra.mxu1 %vm1539_vm15, %v1361_v45 }
 0x876   :  { %1365 = vmatprep.subr.bf16.mxu1 %v1364_v56 }
 0x878   :  { %1267 = vmatmul.mubr.msk.f32.vlgmr.msra.gmra.mrb[4].mxu1 %vm453_vm0, %v736_v62 }
 0x87e   :  { %1367 = vmatpush1.bf16.xpose.msra.mxu1 %v1366_v1 }
 0x87f   :  { %825 = vmatprep.subr.mxu1 %v820_v10 }
 0x886   :  { %826 = vmatpush1.xpose.msra.mxu1 %v819_v11 }
 0x887   :  { %1369 = vmatprep.subr.bf16.mxu1 %v1368_v15 }
 0x8a7   :  { %v1187_v49 = vpop.xlane.xlu0 %1186 }
 0x8a8   :  { %v1625_v51 = vmul.f32 %v1192_v48, %v1187_v49 }
 0x8ab   :  { %v1199_v63 = vpop.xlane.xlu0 %1198 }
 0x8ac   :  { %v1200_v52 = vmul.f32 %v1199_v63, %v1192_v48 }
 0x8ae   :  { %1228 = vperm.xlu0 %1398, %v1200_v52   ;;  %v1147_v52 = vld [vmem:[#allocation2 + $0x1e5] ss:$8 sm:$0x3] }
 0x8af   :  { %v1203_v61 = vpop.permute.xlu0 %1202  ;;  %v1163_v53 = vrot.slane %v1147_v52, %v1468_v24 }
 0x8b0   :  { %v1205_v5 = vadd.f32 %v1203_v61, %v1181_v29 }
 0x8b2   :  { %v1206_v7 = vmul.f32 0.5, %v1205_v5 }
 0x8b4   :  { %v1207_v8 = vsub.f32 %v1187_v49, %v1206_v7 }
 0x8b6   :  { %v1627_v9 = vmul.f32 %v1207_v8, %v1192_v48 }
 0x92d   :  { %v1229_v1 = vpop.permute.xlu0 %1228 }
 0x94b   :  { %v806_v21 = vpop.f32.mrb[4].mxu1 }
 0x94c   :  { %v811_v22 = vmax.f32 %v806_v21, 0.0  ;;  %v808_v23 = vpop.f32.mrb[5].mxu1 }
 0x94d   :  { %v812_v27 = vmax.f32 %v808_v23, 0.0 }
 0x94e   :  { %v987_v32 = vrot.slane %v811_v22, 4  ;;  %v906_v36 = vrot.slane %v811_v22, 2  ;;  %v1068_v39 = vrot.slane %v811_v22, 6 }
 0x94f   :  { %885 = vmatprep.mubr.f32.mxu1 %v812_v27  ;;  %v988_v29 = vrot.slane %v812_v27, 4  ;;  %v907_v30 = vrot.slane %v812_v27, 2  ;;  %v1069_v33 = vrot.slane %v812_v27, 6 }
 0x950   :  { %886 = vmatmul.mubr.f32.vlgmr.msra.gmra.mrb[6].mxu1 %v811_v22 }
 0x951   :  { %1371 = vmatpush1.bf16.xpose.msra.mxu1 %v1370_v28  ;;  %1055 = vmatprep.mubr.f32.mxu0 %v988_v29 }
 0x952   :  { %974 = vmatprep.mubr.f32.mxu1 %v907_v30  ;;  %1056 = vmatmul.mubr.f32.vlgmr.msra.gmra.mrb[10].mxu0 %v987_v32 }
 0x953   :  { %1379 = vmatpush1.bf16.xpose.msra.mxu0 %v1378_v31  ;;  %1136 = vmatprep.mubr.f32.mxu0 %v1069_v33 }
 0x954   :  { %914 = vmatprep.subr.mxu1 %v903_v34  ;;  %1076 = vmatprep.subr.mxu0 %v1067_v35 }
 0x959   :  { %915 = vmatpush1.xpose.msra.mxu1 %v902_v46 }
 0x95b   :  { %1077 = vmatpush1.xpose.msra.mxu0 %v1066_v50 }
 0x95c   :  { %975 = vmatmul.mubr.f32.vlgmr.msra.gmra.mrb[6].mxu1 %v906_v36 }
 0x95e   :  { %1137 = vmatmul.mubr.f32.vlgmr.msra.gmra.mrb[10].mxu0 %v1068_v39 }
 0xa2f   :  { %v976_v57 = vpop.f32.mrb[6].mxu1 }
 0xa30   :  { %v1380_v55 = vadd.f32 %v976_v57, %v895_v41  ;;  %v978_v43 = vpop.f32.mrb[7].mxu1 }
 0xa31   :  { %v1138_v44 = vpop.f32.mrb[10].mxu0 }
 0xa32   :  { %v1381_v45 = vadd.f32 %v1380_v55, %v1138_v44  ;;  %v1140_v62 = vpop.f32.mrb[11].mxu0 }
 0xa34   :  { %v1143_v48 = vmax.f32 %v1381_v45, 0.0 }
 0xa36   :  { %v1154_v49 = vmul.f32 %v1152_v47, %v1143_v48 }
 0xa38   :  { %v1156_v63 = vsel %vm1155_vm1, %v1154_v49, 0.0 }
 0xa39   :  { %1157 = vadd.xlane.f32.xlu1 %v1156_v63 }
 0xac6   :  { %v1158_v54 = vpop.xlane.xlu1 %1157 }
 0xac7   :  { %v1165_v38 = vadd.f32 %v1163_v53, %v1158_v54 }
 0xac9   :  { %v1210_v56 = vadd.f32 %v1625_v51, %v1165_v38  ;;  %v1218_v59 = vadd.f32 %v1627_v9, %v1165_v38 }
 0xacb   :  { %1213 = vperm.xlu1 %1397, %v1210_v56  }
 0xacf   :  { %1221 = vperm.xlu1 %1397, %v1218_v59  }
 0xb4a   :  { %v1214_v60 = vpop.permute.xlu1 %1213 }
 0xb4b   :  { %v1216_v37 = vsel %vm1209_vm2, %v1214_v60, 0.0 }
 0xb4e   :  { %v1222_v61 = vpop.permute.xlu1 %1221 }
 0xb4f   :  { %v1224_v2 = vsel %vm1217_vm3, %v1222_v61, %v1216_v37 }
 0xb50   :  { %v1231_v24 = vsel %vm1225_vm4, %v1229_v1, %v1224_v2 }
 0xb51   :  { %1242 = vst [vmem:[%s1642_s2 + $0x4] sm:$0x3] %v1231_v24 }
 0xb52   :  { %1247 = vsyncpa [#allocation3], 1 }

</bundles_post_ra>
